<compile_context>
chip_gen: v5e
topology: v5e:2x2
jax: 0.10.0
libtpu: 0.0.40
codegen_flags: <defaults>
</compile_context>

<pallas_src>
import jax
import jax.numpy as jnp
from jax.experimental import pallas as pl
from jax.experimental.pallas import tpu as pltpu


def _temporal_mask_kernel(x_ref, keep_ref, o_ref):
    # x_ref:    (TR, TT) tile of the flattened (B*C, T) input
    # keep_ref: (1,  TT) int8 temporal keep-mask (1 = keep, 0 = masked)
    # o_ref:    (TR, TT) output tile
    # Single select keeps the body trivially VPU-light (DMA stays the binding
    # unit, even on v5e); where (not multiply) forces exact 0 for NaN/Inf.
    o_ref[...] = jnp.where(keep_ref[...] != 0, x_ref[...],
                           jnp.zeros_like(x_ref[...]))


def _round_down(n, m):
    return (n // m) * m


def _choose_tiles(rows, T, itemsize):
    """Pick (TR, TT) so a single tile is ~4 MiB (HBM-roofline sweet spot) and
    the double-buffered in+out footprint stays ~16 MiB."""
    sub = {4: 8, 2: 16, 1: 32}.get(itemsize, 8)
    target_bytes = 4 << 20  # per buffer

    # Lane (T) axis: use the full T whenever one sublane-group of full-T rows
    # fits the budget.  Block dims equal to the full array dim are exempt from
    # the (8, 128) divisibility rule, so no padding is ever needed.
    if sub * T * itemsize <= target_bytes:
        tt = T
    else:
        tt = 2048  # multiple of 128; only reached for extremely long T

    max_tr = max(sub, _round_down(target_bytes // (tt * itemsize), sub))
    max_tr = min(max_tr, 1024)
    tr = rows if rows <= max_tr else max_tr
    return tr, tt


def _temporal_mask_pallas(x, keep_i8):
    """x: (B, C, T); keep_i8: (T,) int8 keep-mask (1 = keep, 0 = zeroed)."""
    B, C, T = x.shape
    dtype = x.dtype
    rows = B * C
    x_flat = x.reshape(rows, T)      # free view: rows on sublanes, T on lanes
    keep_row = keep_i8.reshape(1, T)

    itemsize = jnp.dtype(dtype).itemsize
    TR, TT = _choose_tiles(rows, T, itemsize)

    # T is the OUTER grid axis so the keep block index is constant across the
    # inner row steps (stays resident); boundary tiles (if any) are masked by
    # Pallas, so no host-side pad of x and no post-kernel slice.
    grid = (pl.cdiv(T, TT), pl.cdiv(rows, TR))

    out = pl.pallas_call(
        _temporal_mask_kernel,
        out_shape=jax.ShapeDtypeStruct((rows, T), dtype),
        grid_spec=pltpu.PrefetchScalarGridSpec(
            num_scalar_prefetch=0,
            grid=grid,
            in_specs=[
                pl.BlockSpec((TR, TT), lambda t, r: (r, t)),
                pl.BlockSpec((1, TT), lambda t, r: (0, t)),
            ],
            out_specs=pl.BlockSpec((TR, TT), lambda t, r: (r, t)),
        ),
        compiler_params=pltpu.CompilerParams(
            dimension_semantics=("parallel", "parallel"),
            vmem_limit_bytes=32 * 1024 * 1024,
        ),
    )(x_flat, keep_row)

    return out.reshape(B, C, T)


def temporal_mask(x, ratio=0.0, *, key=None, training=True, use_pallas=None):
    """JAX/Pallas equivalent of TemporalMask.forward. x: (B, C, T)."""
    if not training or ratio <= 0.0:
        return x

    B, C, T = x.shape
    num_mask = int(T * ratio)
    if num_mask == 0:
        return x
    if key is None:
        key = jax.random.PRNGKey(0)

    # Host-side glue: temporal keep-mask (equivalent of torch.randperm(T)[:num_mask]).
    # TODO(synk): jax.random.permutation is only distributionally equivalent to
    # torch.randperm; it will not reproduce torch's indices for the same seed.
    perm = jax.random.permutation(key, T)
    mask_idx = perm[:num_mask]
    keep = jnp.ones((T,), dtype=jnp.int8).at[mask_idx].set(0)  # 1 = keep

    if use_pallas is None:
        # Below a few MiB the pallas_call is pure launch/grid overhead; a fused
        # XLA broadcast-select sits at HBM roofline anyway.
        use_pallas = (B * C * T * jnp.dtype(x.dtype).itemsize) >= (4 * 1024 * 1024)
    if not use_pallas:
        return jnp.where(keep.reshape(1, 1, T) != 0, x, jnp.zeros_like(x))

    return _temporal_mask_pallas(x, keep)


if __name__ == "__main__":
    key = jax.random.PRNGKey(0)
    kx, kmask, kx2 = jax.random.split(key, 3)

    # Case 1: lane-aligned shapes (full-T tile, 1x1 grid, unmasked stores).
    B, C, T = 2, 4, 256
    ratio = 0.25  # masks int(256 * 0.25) = 64 time steps
    x = jax.random.normal(kx, (B, C, T), dtype=jnp.float32)

    num_mask = int(T * ratio)
    mask_idx = jax.random.permutation(kmask, T)[:num_mask]
    keep = jnp.ones((T,), dtype=jnp.int8).at[mask_idx].set(0)
    ref = jnp.where(keep.reshape(1, 1, T) != 0, x, jnp.zeros_like(x))

    out = temporal_mask(x, ratio=ratio, key=kmask, training=True, use_pallas=True)
    out = jax.block_until_ready(out)

    assert out.shape == (B, C, T)
    assert out.dtype == x.dtype
    assert jnp.allclose(out, ref), "mismatch vs reference (aligned case)"
    assert jnp.all(out[:, :, mask_idx] == 0)

    # Case 2: ragged shapes (full-array blocks; no padding, no slicing).
    B2, C2, T2 = 2, 3, 50
    ratio2 = 0.2  # masks int(50 * 0.2) = 10 time steps
    x2 = jax.random.normal(kx2, (B2, C2, T2), dtype=jnp.float32)
    num_mask2 = int(T2 * ratio2)
    mask_idx2 = jax.random.permutation(kmask, T2)[:num_mask2]
    keep2 = jnp.ones((T2,), dtype=jnp.int8).at[mask_idx2].set(0)
    ref2 = jnp.where(keep2.reshape(1, 1, T2) != 0, x2, jnp.zeros_like(x2))

    out2 = temporal_mask(x2, ratio=ratio2, key=kmask, training=True, use_pallas=True)
    out2 = jax.block_until_ready(out2)

    assert out2.shape == (B2, C2, T2)
    assert jnp.allclose(out2, ref2), "mismatch vs reference (ragged case)"
    assert jnp.all(out2[:, :, mask_idx2] == 0)

    # Eval mode: identity pass-through.
    assert jnp.all(temporal_mask(x, ratio=ratio, key=kmask, training=False) == x)

    print("KERNEL_OK")
</pallas_src>

<mosaic_0001>
module attributes {stable_mosaic.version = 11 : i64} {
  func.func @_temporal_mask_kernel(%arg0: i32, %arg1: i32, %arg2: memref<8x256xf32, #tpu.memory_space<vmem>>, %arg3: memref<1x256xi8, #tpu.memory_space<vmem>>, %arg4: memref<8x256xf32, #tpu.memory_space<vmem>>) attributes {dimension_semantics = [#tpu.dimension_semantics<parallel>, #tpu.dimension_semantics<parallel>], iteration_bounds = array<i64: 1, 1>, scalar_prefetch = 0 : i64, scratch_operands = 0 : i64, tpu.core_type = #tpu.core_type<tc>, window_params = [{transform_indices = @transform_0, window_bounds = array<i64: 8, 256>}, {transform_indices = @transform_1, window_bounds = array<i64: 1, 256>}, {transform_indices = @transform_2, window_bounds = array<i64: 8, 256>}]} {
    %c0 = arith.constant 0 : index
    %c0_0 = arith.constant 0 : index
    %0 = vector.load %arg3[%c0, %c0_0] : memref<1x256xi8, #tpu.memory_space<vmem>>, vector<1x256xi8>
    %c0_i8 = arith.constant 0 : i8
    %1 = vector.broadcast %c0_i8 : i8 to vector<1x256xi8>
    %2 = arith.cmpi ne, %0, %1 : vector<1x256xi8>
    %c0_1 = arith.constant 0 : index
    %c0_2 = arith.constant 0 : index
    %3 = vector.load %arg2[%c0_1, %c0_2] : memref<8x256xf32, #tpu.memory_space<vmem>>, vector<8x256xf32>
    %cst = arith.constant 0.000000e+00 : f32
    %4 = vector.broadcast %cst : f32 to vector<8x256xf32>
    %5 = vector.shape_cast %2 : vector<1x256xi1> to vector<1x256xi1>
    %6 = vector.broadcast %5 : vector<1x256xi1> to vector<8x256xi1>
    %7 = arith.select %6, %3, %4 : vector<8x256xi1>, vector<8x256xf32>
    %c0_3 = arith.constant 0 : index
    %c0_4 = arith.constant 0 : index
    %8 = vector.load %arg4[%c0_3, %c0_4] : memref<8x256xf32, #tpu.memory_space<vmem>>, vector<8x256xf32>
    tpu.vector_store %arg4[%c0_3, %c0_4], %7 {strides = array<i32>} : memref<8x256xf32, #tpu.memory_space<vmem>>, vector<8x256xf32>,
    return
  }
  func.func @transform_0(%arg0: i32, %arg1: i32) -> (i32, i32) {
    %c0_i32 = arith.constant 0 : i32
    return %arg1, %arg0 : i32, i32
  }
  func.func @transform_1(%arg0: i32, %arg1: i32) -> (i32, i32) {
    %c0_i32 = arith.constant 0 : i32
    %c0_i32_0 = arith.constant 0 : i32
    return %c0_i32, %arg0 : i32, i32
  }
  func.func @transform_2(%arg0: i32, %arg1: i32) -> (i32, i32) {
    %c0_i32 = arith.constant 0 : i32
    return %arg1, %arg0 : i32, i32
  }
}

</mosaic_0001>

<bundles_post_ra>
// kernel: tpu_custom_call.1
= control target key start
LH: loop header
LB: loop body
LE: loop exit
PB: predicated region body
PF: predicated region fallthrough
CT: control target
= control target key end

     0   :  { %7 = vsyncpa [#allocation3], 0  ;;  %s192_s0 = inlined_call_operand.hbm [shape: f32[8,256], index: 0, kind: input, shape index: {}]   ;;  %s193_s1 = inlined_call_operand.hbm [shape: s8[1,256], index: 1, kind: input, shape index: {}]   ;;  %s194_s2 = inlined_call_operand.hbm [shape: f32[8,256], index: 2, kind: output, shape index: {}]  }
   0x1   :  { %8 = vsyncpa [#allocation6], 0 }
   0x2   :  { %9 = vsyncpa [#allocation4], 0  ;;  %s15_s11 = sshll.u32 %s192_s0, 4  ;;  %s164_s12 = smov [#allocation2]   ;;  %s16_s11 = int_to_ptr.hbm [resolvable:$true] %s15_s11 }
   0x3   :  { %s17_s13 = sshll.u32 %s164_s12, 4  ;;  %s26_s16 = sshll.u32 %s193_s1, 4  ;;  %s18_s13 = int_to_ptr.vmem [resolvable:$true] %s17_s13  ;;  %s27_s16 = int_to_ptr.hbm [resolvable:$true] %s26_s16 }
   0x4   :  { %20 = dma.hbm_to_vmem [thread:$0]  %s16_s11, 256, %s18_s13, [#allocation3]  }
   0x5   :  { %s165_s17 = smov [#allocation5]  }
   0x6   :  { %s28_s18 = sshll.u32 %s165_s17, 4  ;;  %s29_s18 = int_to_ptr.vmem [resolvable:$true] %s28_s18 }
   0x7   :  { %31 = dma.hbm_to_vmem [thread:$0]  %s27_s16, 32, %s29_s18, [#allocation6]  }
   0x8   :  { %158 = dma.done.wait [#allocation3], 256  }
   0x9   :  { %159 = vsyncadd [#allocation3], 4294967040 }
   0xa   :  { %160 = dma.done.wait [#allocation6], 32  }
   0xb   :  { %161 = vsyncadd [#allocation6], 4294967264  ;;  %v42_v0 = vld [vmem:[#allocation5] sm:$0x3]  ;;  %v166_v1 = vmov 0   ;;  %v44_v9 = vld [vmem:[#allocation2] sm:$0xff] }
   0xc   :  { %vm43_vm0 = vnez %v42_v0  ;;  %v45_v11 = vld [vmem:[#allocation2 + $0x8] sm:$0xff]  ;;  %s167_s0 = smov [#allocation7]   ;;  %s71_s21 = sshll.u32 %s194_s2, 4  ;;  %s72_s21 = int_to_ptr.hbm [resolvable:$true] %s71_s21 }
   0xd   :  { %v46_v2 = vsel %vm43_vm0, 16843009, %v166_v1  ;;  %s69_s1 = sshll.u32 %s167_s0, 4  ;;  %s70_s1 = int_to_ptr.vmem [resolvable:$true] %s69_s1 }
   0xe   :  { %v47_v3 = vunpack.c.0.s8 %v46_v2 }
  0x10   :  { %vm48_vm1 = vcmp.ne.s32.totalorder %v47_v3, 0 }
  0x11   :  { %v49_v4 = vsel %vm48_vm1, 1, %v166_v1 }
  0x12   :  { %v50_v5 = vperm.slane %v49_v4, 0  ;;  %v51_v6 = vperm.slane %v49_v4, 4 }
  0x14   :  { %vm52_vm2 = vcmp.ne.s32.totalorder %v50_v5, 0  ;;  %vm53_vm3 = vcmp.ne.s32.totalorder %v51_v6, 0 }
  0x15   :  { %v54_v7 = vsel %vm52_vm2, 1, %v166_v1  ;;  %v55_v8 = vsel %vm53_vm3, 1, %v166_v1 }
  0x16   :  { %v56_v10 = vperm.slane %v54_v7, 0  ;;  %v57_v12 = vperm.slane %v55_v8, 0 }
  0x18   :  { %vm58_vm4 = vcmp.eq.s32.totalorder %v56_v10, 1  ;;  %vm59_vm5 = vcmp.eq.s32.totalorder %v57_v12, 1 }
  0x19   :  { %v60_v13 = vsel %vm58_vm4, %v44_v9, 0.0  ;;  %v61_v14 = vsel %vm59_vm5, %v45_v11, 0.0 }
  0x1a   :  { %62 = vst [vmem:[#allocation7] sm:$0xff] %v60_v13 }
  0x1b   :  { %63 = vst [vmem:[#allocation7 + $0x8] sm:$0xff] %v61_v14 }
  0x1c   :  { %74 = dma.vmem_to_hbm [thread:$0]  %s70_s1, 256, %s72_s21, [#allocation4]  }
  0x1d   :  { %162 = dma.done.wait [#allocation4], 256  }
  0x1e   :  { %163 = vsyncadd [#allocation4], 4294967040 }
  0x1f   :  { %79 = vsyncpa [#allocation3], 1 }
  0x20   :  { %80 = vsyncpa [#allocation6], 1 }
  0x21   :  { %81 = vsyncpa [#allocation4], 1 }

</bundles_post_ra>
